<compile_context>
chip_gen: v7x
topology: tpu7x:2x2x1
jax: 0.10.0
libtpu: 0.0.40
codegen_flags: <defaults>
</compile_context>

<pallas_src>
import jax
import jax.numpy as jnp
from jax import lax
from jax.experimental import pallas as pl
from jax.experimental.pallas import tpu as pltpu


def _make_random_shift_kernel(pad: int, block_b: int, n_total: int,
                              row_off: int):
    def kernel(shift_ref, x_ref, o_ref, xpad_ref):
        # shift_ref : SMEM (2*N,) int32 scalar-prefetch; [sx0, sy0, sx1, sy1, ...]
        # x_ref     : VMEM (block_b, C, H, W)  input block
        # o_ref     : VMEM (block_b, C, H, W)  output block
        # xpad_ref  : VMEM (C, row_off + H + pad, W)  one row-padded sample
        _, C, H, W = x_ref.shape
        blk = pl.program_id(0)

        def body(i, carry):
            # Clamp the global sample index so a partial tail block never reads
            # out-of-range SMEM; the corresponding output rows are dropped by
            # Pallas's block write masking anyway.
            b = jnp.minimum(blk * block_b + i, n_total - 1)
            sx = shift_ref[2 * b]                              # width  shift
            sy = jnp.clip(shift_ref[2 * b + 1], 0, 2 * pad)    # height shift

            # ---- Row gather (sublane axis), MXU-free ----------------------
            # Replicate-pad the sample rows into scratch: interior lands at the
            # sublane-aligned offset `row_off`; edge rows replicate row 0/H-1.
            xpad_ref[:, row_off:row_off + H, :] = x_ref[i]
            xpad_ref[:, row_off - pad:row_off, :] = jnp.broadcast_to(
                x_ref[i, :, :1, :], (C, pad, W))
            xpad_ref[:, row_off + H:row_off + H + pad, :] = jnp.broadcast_to(
                x_ref[i, :, H - 1:, :], (C, pad, W))
            # Shifted, edge-clamped rows: dynamic-start window (sublane axis).
            z = xpad_ref[:, pl.ds(row_off - pad + sy, H), :]   # (C, H, W)

            # ---- Column gather (lane axis): one-hot matmul batched over C --
            dx = sx - pad
            src = lax.broadcasted_iota(jnp.int32, (W, W), 0)   # source col k
            dst = lax.broadcasted_iota(jnp.int32, (W, W), 1)   # output col j
            q = (src == jnp.clip(dst + dx, 0, W - 1)).astype(x_ref.dtype)
            # (C, H, W) -> (C*H, W): free when H % 8 == 0 (aligned merge).
            out = jnp.dot(z.reshape(C * H, W), q,
                          preferred_element_type=jnp.float32)
            # Single lane-dense slab store per sample.
            o_ref[i] = out.reshape(C, H, W).astype(o_ref.dtype)
            return carry

        lax.fori_loop(0, block_b, body, 0)

    return kernel


def random_shifts_aug(x: jax.Array, shifts: jax.Array, pad: int,
                      block_b=None) -> jax.Array:
    """x: (N, C, H, W); shifts: (N, 2) int32 with [sx, sy] in [0, 2*pad]."""
    n, c, h, w = x.shape
    assert h == w, "RandomShiftsAug requires square images"
    if pad == 0:
        return x
    assert 0 < pad < h

    shifts = shifts.astype(jnp.int32).reshape(-1)        # flat (2N,) for SMEM

    itemsize = jnp.dtype(x.dtype).itemsize
    per_sample = c * h * w * itemsize
    if block_b is None:
        # ~4 MiB of input per grid step: large enough to amortize the ~0.35 us
        # fixed per-step cost, small enough that double-buffered in+out blocks
        # (~16 MiB) fit scoped VMEM on v5e/v6e/v7x with the explicit limit below.
        block_b = int(max(1, min(n, (4 << 20) // per_sample)))

    row_off = ((pad + 7) // 8) * 8          # sublane-aligned interior offset
    hp = row_off + h + pad                  # scratch rows
    scratch_bytes = c * hp * w * itemsize
    vmem_need = 4 * block_b * per_sample + scratch_bytes    # 2x(in+out) buffers
    vmem_limit = int(min(48 << 20, max(32 << 20, 2 * vmem_need)))

    kernel = _make_random_shift_kernel(pad, block_b, n, row_off)
    grid_spec = pltpu.PrefetchScalarGridSpec(
        num_scalar_prefetch=1,
        grid=(pl.cdiv(n, block_b),),
        in_specs=[pl.BlockSpec((block_b, c, h, w),
                               lambda b, s_ref: (b, 0, 0, 0))],
        out_specs=pl.BlockSpec((block_b, c, h, w),
                               lambda b, s_ref: (b, 0, 0, 0)),
        scratch_shapes=[pltpu.VMEM((c, hp, w), x.dtype)],
    )
    cost = pl.CostEstimate(
        flops=2 * n * c * h * w * w,        # one (C*H,W)@(W,W) per sample
        transcendentals=0,
        bytes_accessed=2 * n * c * h * w * itemsize + shifts.size * 4,
    )
    return pl.pallas_call(
        kernel,
        out_shape=jax.ShapeDtypeStruct((n, c, h, w), x.dtype),
        grid_spec=grid_spec,
        compiler_params=pltpu.CompilerParams(
            dimension_semantics=("parallel",),
            vmem_limit_bytes=vmem_limit),
        cost_estimate=cost,
    )(shifts, x)


class RandomShiftsAug:
    """JAX/Pallas port of the PyTorch RandomShiftsAug module."""

    def __init__(self, pad: int):
        self.pad = pad

    def __call__(self, x: jax.Array, key: jax.Array) -> jax.Array:
        n = x.shape[0]
        # torch.randint(0, 2*pad + 1, (n, 1, 1, 2)): [..., 0]=x, [..., 1]=y.
        shifts = jax.random.randint(key, (n, 2), 0, 2 * self.pad + 1,
                                    dtype=jnp.int32)
        return random_shifts_aug(x, shifts, self.pad)

    def forward_traj(self, x: jax.Array, key: jax.Array) -> jax.Array:
        n, t, c, h, w = x.shape
        # Module draws per (n*t) frame from [1, 2*pad] for forward_traj.
        shifts = jax.random.randint(key, (n * t, 2), 1, 2 * self.pad + 1,
                                    dtype=jnp.int32)
        out = random_shifts_aug(x.reshape(n * t, c, h, w), shifts, self.pad)
        return out.reshape(n, t, c, h, w)


def _reference(x, shifts, pad):
    # Pure-JAX reference: replicate pad + per-sample integer crop
    # (mathematically identical to grid_sample with the module's grid).
    xp = jnp.pad(x, ((0, 0), (0, 0), (pad, pad), (pad, pad)), mode="edge")
    n, _, h, w = x.shape
    outs = []
    for i in range(n):
        sx = int(shifts[i, 0])
        sy = int(shifts[i, 1])
        outs.append(xp[i, :, sy:sy + h, sx:sx + w])
    return jnp.stack(outs, axis=0)


if __name__ == "__main__":
    pad = 2
    n, c, h, w = 2, 4, 16, 16

    key = jax.random.PRNGKey(0)
    kx, kshift = jax.random.split(key)
    x = jax.random.normal(kx, (n, c, h, w), dtype=jnp.float32)
    shifts = jax.random.randint(kshift, (n, 2), 0, 2 * pad + 1,
                                dtype=jnp.int32)

    out = jax.block_until_ready(random_shifts_aug(x, shifts, pad))

    ref = _reference(x, shifts, pad)
    assert out.shape == (n, c, h, w)
    assert jnp.allclose(out, ref, atol=1e-5, rtol=1e-5), "mismatch vs reference"

    print("KERNEL_OK")
</pallas_src>

<mosaic_0001>
module attributes {stable_mosaic.version = 11 : i64} {
  func.func @kernel(%arg0: i32, %arg1: memref<4xi32, #tpu.memory_space<smem>>, %arg2: memref<2x4x16x16xf32, #tpu.memory_space<vmem>>, %arg3: memref<2x4x16x16xf32, #tpu.memory_space<vmem>>, %arg4: memref<4x26x16xf32, #tpu.memory_space<vmem>>) attributes {dimension_semantics = [#tpu.dimension_semantics<parallel>], iteration_bounds = array<i64: 1>, scalar_prefetch = 1 : i64, scratch_operands = 1 : i64, tpu.core_type = #tpu.core_type<tc>, window_params = [{transform_indices = @transform_0, window_bounds = array<i64: 2, 4, 16, 16>}, {transform_indices = @transform_1, window_bounds = array<i64: 2, 4, 16, 16>}]} {
    %c0_i32 = arith.constant 0 : i32
    %c2_i32 = arith.constant 2 : i32
    %0 = arith.addi %c0_i32, %c2_i32 : i32
    %c1_i32 = arith.constant 1 : i32
    scf.for %arg5 = %c0_i32 to %0 step %c1_i32  : i32 {
      %c2_i32_1 = arith.constant 2 : i32
      %1 = arith.muli %arg0, %c2_i32_1 : i32
      %2 = arith.addi %1, %arg5 : i32
      %c1_i32_2 = arith.constant 1 : i32
      %3 = arith.minsi %2, %c1_i32_2 : i32
      %c2_i32_3 = arith.constant 2 : i32
      %4 = arith.muli %c2_i32_3, %3 : i32
      %5 = arith.index_cast %4 : i32 to index
      %6 = memref.load %arg1[%5] : memref<4xi32, #tpu.memory_space<smem>>
      %c2_i32_4 = arith.constant 2 : i32
      %7 = arith.muli %c2_i32_4, %3 : i32
      %c1_i32_5 = arith.constant 1 : i32
      %8 = arith.addi %7, %c1_i32_5 : i32
      %9 = arith.index_cast %8 : i32 to index
      %10 = memref.load %arg1[%9] : memref<4xi32, #tpu.memory_space<smem>>
      %c0_i32_6 = arith.constant 0 : i32
      %c4_i32 = arith.constant 4 : i32
      %11 = arith.maxsi %c0_i32_6, %10 : i32
      %12 = arith.minsi %c4_i32, %11 : i32
      %13 = arith.index_cast %arg5 : i32 to index
      %c0 = arith.constant 0 : index
      %c0_7 = arith.constant 0 : index
      %c0_8 = arith.constant 0 : index
      %14 = vector.load %arg2[%13, %c0, %c0_7, %c0_8] : memref<2x4x16x16xf32, #tpu.memory_space<vmem>>, vector<1x4x16x16xf32>
      %15 = vector.shape_cast %14 : vector<1x4x16x16xf32> to vector<4x16x16xf32>
      %c0_9 = arith.constant 0 : index
      %c8 = arith.constant 8 : index
      %c0_10 = arith.constant 0 : index
      %16 = vector.load %arg4[%c0_9, %c8, %c0_10] : memref<4x26x16xf32, #tpu.memory_space<vmem>>, vector<4x16x16xf32>
      tpu.vector_store %arg4[%c0_9, %c8, %c0_10], %15 {strides = array<i32>} : memref<4x26x16xf32, #tpu.memory_space<vmem>>, vector<4x16x16xf32>,
      %17 = arith.index_cast %arg5 : i32 to index
      %c0_11 = arith.constant 0 : index
      %c0_12 = arith.constant 0 : index
      %c0_13 = arith.constant 0 : index
      %18 = vector.load %arg2[%17, %c0_11, %c0_12, %c0_13] : memref<2x4x16x16xf32, #tpu.memory_space<vmem>>, vector<1x4x1x16xf32>
      %19 = vector.shape_cast %18 : vector<1x4x1x16xf32> to vector<4x1x16xf32>
      %20 = vector.shape_cast %19 : vector<4x1x16xf32> to vector<4x1x16xf32>
      %21 = vector.broadcast %20 : vector<4x1x16xf32> to vector<4x2x16xf32>
      %c0_14 = arith.constant 0 : index
      %c6 = arith.constant 6 : index
      %c0_15 = arith.constant 0 : index
      %22 = vector.load %arg4[%c0_14, %c6, %c0_15] : memref<4x26x16xf32, #tpu.memory_space<vmem>>, vector<4x2x16xf32>
      tpu.vector_store %arg4[%c0_14, %c6, %c0_15], %21 {strides = array<i32>} : memref<4x26x16xf32, #tpu.memory_space<vmem>>, vector<4x2x16xf32>,
      %23 = arith.index_cast %arg5 : i32 to index
      %c0_16 = arith.constant 0 : index
      %c15 = arith.constant 15 : index
      %c0_17 = arith.constant 0 : index
      %24 = vector.load %arg2[%23, %c0_16, %c15, %c0_17] : memref<2x4x16x16xf32, #tpu.memory_space<vmem>>, vector<1x4x1x16xf32>
      %25 = vector.shape_cast %24 : vector<1x4x1x16xf32> to vector<4x1x16xf32>
      %26 = vector.shape_cast %25 : vector<4x1x16xf32> to vector<4x1x16xf32>
      %27 = vector.broadcast %26 : vector<4x1x16xf32> to vector<4x2x16xf32>
      %c0_18 = arith.constant 0 : index
      %c24 = arith.constant 24 : index
      %c0_19 = arith.constant 0 : index
      %28 = vector.load %arg4[%c0_18, %c24, %c0_19] : memref<4x26x16xf32, #tpu.memory_space<vmem>>, vector<4x2x16xf32>
      tpu.vector_store %arg4[%c0_18, %c24, %c0_19], %27 {strides = array<i32>} : memref<4x26x16xf32, #tpu.memory_space<vmem>>, vector<4x2x16xf32>,
      %c6_i32 = arith.constant 6 : i32
      %29 = arith.addi %c6_i32, %12 : i32
      %c0_20 = arith.constant 0 : index
      %30 = arith.index_cast %29 : i32 to index
      %c0_21 = arith.constant 0 : index
      %31 = vector.load %arg4[%c0_20, %30, %c0_21] : memref<4x26x16xf32, #tpu.memory_space<vmem>>, vector<4x16x16xf32>
      %c2_i32_22 = arith.constant 2 : i32
      %32 = arith.subi %6, %c2_i32_22 : i32
      %33 = tpu.iota {dimensions = array<i32: 0>} : vector<16x16xi32>
      %34 = tpu.iota {dimensions = array<i32: 1>} : vector<16x16xi32>
      %35 = vector.broadcast %32 : i32 to vector<16x16xi32>
      %36 = arith.addi %34, %35 : vector<16x16xi32>
      %c0_i32_23 = arith.constant 0 : i32
      %c15_i32 = arith.constant 15 : i32
      %37 = vector.broadcast %c0_i32_23 : i32 to vector<16x16xi32>
      %38 = arith.maxsi %37, %36 : vector<16x16xi32>
      %39 = vector.broadcast %c15_i32 : i32 to vector<16x16xi32>
      %40 = arith.minsi %39, %38 : vector<16x16xi32>
      %41 = arith.cmpi eq, %33, %40 : vector<16x16xi32>
      %42 = arith.extui %41 : vector<16x16xi1> to vector<16x16xi32>
      %43 = arith.sitofp %42 : vector<16x16xi32> to vector<16x16xf32>
      %44 = vector.shape_cast %31 : vector<4x16x16xf32> to vector<64x16xf32>
      %cst = arith.constant dense<0.000000e+00> : vector<64x16xf32>
      %45 = tpu.matmul %44, %43, %cst {dimension_numbers = #tpu.dot_dimension_numbers<[1], [0], [0], [1], [0, 0, 1, 1], [], []>} : vector<64x16xf32>, vector<16x16xf32>, vector<64x16xf32> -> vector<64x16xf32>
      %46 = vector.shape_cast %45 : vector<64x16xf32> to vector<4x16x16xf32>
      %47 = arith.index_cast %arg5 : i32 to index
      %c0_24 = arith.constant 0 : index
      %c0_25 = arith.constant 0 : index
      %c0_26 = arith.constant 0 : index
      %48 = vector.load %arg3[%47, %c0_24, %c0_25, %c0_26] : memref<2x4x16x16xf32, #tpu.memory_space<vmem>>, vector<1x4x16x16xf32>
      %49 = vector.shape_cast %48 : vector<1x4x16x16xf32> to vector<4x16x16xf32>
      %50 = vector.shape_cast %46 : vector<4x16x16xf32> to vector<1x4x16x16xf32>
      tpu.vector_store %arg3[%47, %c0_24, %c0_25, %c0_26], %50 {strides = array<i32>} : memref<2x4x16x16xf32, #tpu.memory_space<vmem>>, vector<1x4x16x16xf32>,
    }
    %c2_i32_0 = arith.constant 2 : i32
    return
  }
  func.func @transform_0(%arg0: i32, %arg1: memref<4xi32, #tpu.memory_space<smem>>) -> (i32, i32, i32, i32) {
    %c0_i32 = arith.constant 0 : i32
    %c0_i32_0 = arith.constant 0 : i32
    %c0_i32_1 = arith.constant 0 : i32
    %c0_i32_2 = arith.constant 0 : i32
    return %arg0, %c0_i32, %c0_i32_0, %c0_i32_1 : i32, i32, i32, i32
  }
  func.func @transform_1(%arg0: i32, %arg1: memref<4xi32, #tpu.memory_space<smem>>) -> (i32, i32, i32, i32) {
    %c0_i32 = arith.constant 0 : i32
    %c0_i32_0 = arith.constant 0 : i32
    %c0_i32_1 = arith.constant 0 : i32
    %c0_i32_2 = arith.constant 0 : i32
    return %arg0, %c0_i32, %c0_i32_0, %c0_i32_1 : i32, i32, i32, i32
  }
}

</mosaic_0001>

<bundles_post_ra>
// kernel: tpu_custom_call.1
= control target key start
LH: loop header
LB: loop body
LE: loop exit
PB: predicated region body
PF: predicated region fallthrough
CT: control target
= control target key end

     0   :  { %s588_s0 = inlined_call_operand.hbm [shape: s32[4], index: 0, kind: input, shape index: {}]   ;;  %s589_s1 = inlined_call_operand.hbm [shape: f32[2,4,16,16], index: 1, kind: input, shape index: {}]   ;;  %s590_s2 = inlined_call_operand.hbm [shape: f32[2,4,16,16], index: 2, kind: output, shape index: {}]  }
   0x1   :  { %s392_s11 = scalar_lea.hbm %s588_s0, 16 }
   0x2   :  { %p393_p0 = scmp.ne.s32.totalorder %s588_s0, %s392_s11  ;;  %p396_p1 = scmp.lt.u32.totalorder %s392_s11, %s588_s0 }
   0x4   :  { %p398_p2 = pnand %p396_p1, %p393_p0 }
   0x6   :  { %401 = shalt.err (!%p398_p2)  }
   0x7   :  { %s460_s16 = smov [#allocation4]  }
   0x8   :  { %8 = dma.hbm_to_smem %s588_s0, 16, %s460_s16, [#allocation3] }
   0x9   :  { %450 = dma.done.wait [#allocation3], 16 }
   0xa   :  { %451 = vsyncadd [#allocation3], 4294967280 }
   0xb   :  { %10 = sfence }
   0xc   :  { %11 = vsyncpa [#allocation6], 0 }
   0xd   :  { %12 = vsyncpa [#allocation7], 0  ;;  %s461_s19 = smov [#allocation5]   ;;  %s402_s23 = scalar_lea.hbm %s589_s1, 2048 }
   0xe   :  { %s18_s20 = sshll.u32 %s461_s19, 4  ;;  %p403_p3 = scmp.ne.s32.totalorder %s589_s1, %s402_s23  ;;  %s19_s20 = int_to_ptr.vmem [resolvable:$true] %s18_s20 }
   0xf   :  { %p406_p4 = scmp.lt.u32.totalorder %s402_s23, %s589_s1 }
  0x11   :  { %p408_p5 = pnand %p406_p4, %p403_p3 }
  0x13   :  { %411 = shalt.err (!%p408_p5)
}
  0x14   :  { %s412_s0 = scalar_lea.vmem %s19_s20, 2048  ;;  %p417_p7 = scmp.lt.s32.totalorder %s19_s20, %s19_s20 }
  0x15   :  { %p413_p6 = scmp.ne.s32.totalorder %s19_s20, %s412_s0  ;;  %p418_p8 = scmp.lt.s32.totalorder %s412_s0, %s412_s0 }
  0x17   :  { %p419_p9 = por %p418_p8, %p417_p7 }
  0x19   :  { %p420_p10 = pnand %p419_p9, %p413_p6 }
  0x1b   :  { %423 = shalt.err (!%p420_p10)
}
  0x1c   :  { %s462_s28 = smov 128   ;;  %s463_s29 = smov 8  }
  0x1d   :  { %24 = dma.hbm_to_vmem [thread:$0]  %s589_s1, 2048, %s19_s20, [#allocation6], %s462_s28, %s462_s28, %s463_s29  }
  0x1e   :  { %452 = dma.done.wait [#allocation6], 2048  }
  0x1f   :  { %453 = vsyncadd [#allocation6], 4294965248  ;;  %s508_s4 = smov 0  }
  0x20 LB: > { %p36_p11 = scmp.lt.s32.totalorder %s458_s4, 1  ;;  %s314_s5 = sshll.u32 %s458_s4, 6  ;;  %vm56_vm0 = vcmask 130048   ;;  %vm85_vm1 = vcmask 123904   ;;  %v125_v9 = vlaneseq  ;;  %v464_v26 = vmov 1.0|1.0   ;;  %s458_s4 = sphi %s508_s4, %s33_s4  }
  0x21   : > { %s518_s7 = scalar_lea.vmem [#allocation5], %s314_s5  ;;  %s271_s13 = scalar_lea.vmem [#allocation8], %s314_s5 }
  0x22   : > { %s37_s6 = scalar_select %p36_p11, %s458_s4, 1  ;;  %v48_v0 = vld [vmem:[%s518_s7] sm:$0xff]  ;;  %v49_v1 = vld [vmem:[%s518_s7 + $0x8] sm:$0xff]  ;;  %v50_v2 = vld [vmem:[%s518_s7 + $0x10] sm:$0xff]  ;;  %v129_v17 = vand.u32 127, %v125_v9  ;;  %v126_v18 = vshrl.u32 %v125_v9, 7 }
  0x23   : > { %v51_v3 = vld [vmem:[%s518_s7 + $0x18] sm:$0xff]  ;;  %v52_v4 = vld [vmem:[%s518_s7 + $0x20] sm:$0xff]  ;;  %v53_v5 = vld [vmem:[%s518_s7 + $0x28] sm:$0xff]  ;;  %57 = vst.msk [vmem:[#allocation2 + $0x8] sm:$0xff] %vm56_vm0, %v48_v0  ;;  %s33_s4 = sadd.s32 1, %s458_s4  }
  0x24   : > { %58 = vst.msk [vmem:[#allocation2 + $0x10] sm:$0xff] %vm56_vm0, %v49_v1  ;;  %59 = vst.msk [vmem:[#allocation2 + $0x28] sm:$0xff] %vm56_vm0, %v50_v2  ;;  %s308_s1 = sshll.u32 %s37_s6, 1  ;;  %v54_v6 = vld [vmem:[%s518_s7 + $0x30] sm:$0xff]  ;;  %v55_v7 = vld [vmem:[%s518_s7 + $0x38] sm:$0xff]  ;;  %v127_v21 = vadd.s32 8, %v126_v18 }
  0x25   : > { %60 = vst.msk [vmem:[#allocation2 + $0x30] sm:$0xff] %vm56_vm0, %v51_v3  ;;  %61 = vst.msk [vmem:[#allocation2 + $0x48] sm:$0xff] %vm56_vm0, %v52_v4  ;;  %v315_v8 = vld [vmem:[%s518_s7] ss:$0 sm:$0xff]  ;;  %s39_s8 = sld [smem:[#allocation4 + %s308_s1]]  ;;  %s40_s9 = sadd.s32 1, %s308_s1 }
  0x26   : > { %62 = vst.msk [vmem:[#allocation2 + $0x50] sm:$0xff] %vm56_vm0, %v53_v5  ;;  %63 = vst.msk [vmem:[#allocation2 + $0x68] sm:$0xff] %vm56_vm0, %v54_v6  ;;  %v316_v10 = vld [vmem:[%s518_s7 + $0x10] ss:$0 sm:$0xff]  ;;  %v317_v11 = vld [vmem:[%s518_s7 + $0x20] ss:$0 sm:$0xff] }
  0x27   : > { %64 = vst.msk [vmem:[#allocation2 + $0x70] sm:$0xff] %vm56_vm0, %v55_v7  ;;  %s41_s10 = sld [smem:[#allocation4 + %s40_s9]]  ;;  %v318_v12 = vld [vmem:[%s518_s7 + $0x30] ss:$0 sm:$0xff]  ;;  %v319_v13 = vld [vmem:[%s518_s7 + $0xf] ss:$0 sm:$0xff] }
  0x28   : > { %86 = vst.msk [vmem:[#allocation2 + $0x6] sm:$0x3] %vm85_vm1, %v315_v8  ;;  %87 = vst.msk [vmem:[#allocation2 + $0x26] sm:$0x3] %vm85_vm1, %v316_v10  ;;  %v320_v14 = vld [vmem:[%s518_s7 + $0x1f] ss:$0 sm:$0xff] }
  0x29   : > { %88 = vst.msk [vmem:[#allocation2 + $0x46] sm:$0x3] %vm85_vm1, %v317_v11  ;;  %89 = vst.msk [vmem:[#allocation2 + $0x66] sm:$0x3] %vm85_vm1, %v318_v12  ;;  %v321_v15 = vld [vmem:[%s518_s7 + $0x2f] ss:$0 sm:$0xff] }
  0x2a   : > { %v322_v16 = vld [vmem:[%s518_s7 + $0x3f] ss:$0 sm:$0xff]  ;;  %110 = vst.msk [vmem:[#allocation2 + $0x18] sm:$0x3] %vm85_vm1, %v319_v13  ;;  %111 = vst.msk [vmem:[#allocation2 + $0x38] sm:$0x3] %vm85_vm1, %v320_v14 }
  0x2b   : > { %112 = vst.msk [vmem:[#allocation2 + $0x58] sm:$0x3] %vm85_vm1, %v321_v15  ;;  %113 = vst.msk [vmem:[#allocation2 + $0x78] sm:$0x3] %vm85_vm1, %v322_v16  ;;  %s331_s11 = sadd.s32 4294967294, %s39_s8  ;;  %p30_p0 = scmp.ge.s32.totalorder %s33_s4, 2  }
  0x2c   : > { %v130_v19 = vstv %s331_s11  ;;  %s465_s14 = smov (%p30_p0), [#allocation8]  }
  0x2d   : > { %p42_p12 = scmp.gt.s32.totalorder %s41_s10, 0  ;;  %p309_p13 = scmp.lt.s32.totalorder %s41_s10, 4  ;;  %v131_v20 = vadd.s32 %v130_v19, %v129_v17 }
  0x2e   :  { %s285_s15 = sshll.u32 (%p30_p0), %s465_s14, 4  ;;  %s286_s15 = int_to_ptr.vmem [resolvable:$true] %s285_s15 }
  0x2f   : > { %s592_s10 = smov (!%p42_p12, %s41_s10), 0  ;;  %vm132_vm2 = vcmp.gt.s32.totalorder %v131_v20, 0  ;;  %s424_s16 = scalar_lea.vmem (%p30_p0), %s286_s15, 2048 }
  0x30   : > { %s594_s10 = smov (!%p309_p13, %s592_s10), 4  ;;  %v133_v22 = vsel %vm132_vm2, %v131_v20, 0  ;;  %p425_p1 = scmp.ne.s32.totalorder (%p30_p0), %s286_s15, %s424_s16 }
  0x31   : > { %vm134_vm3 = vcmp.lt.s32.totalorder %v133_v22, 15  ;;  %s299_s12 = scalar_lea.vmem [#allocation2], %s594_s10  ;;  %p429_p2 = scmp.lt.s32.totalorder (%p30_p0), %s286_s15, %s286_s15 }
  0x32   : > { %v135_v23 = vsel %vm134_vm3, %v133_v22, 15  ;;  %v323_v24 = vld [vmem:[%s299_s12 + $0x6] sm:$0xff]  ;;  %v324_v27 = vld [vmem:[%s299_s12 + $0xe] sm:$0xff]  ;;  %p430_p3 = scmp.lt.s32.totalorder (%p30_p0), %s424_s16, %s424_s16 }
  0x33   : > { %vm136_vm4 = vcmp.eq.s32.totalorder %v126_v18, %v135_v23  ;;  %vm137_vm5 = vcmp.eq.s32.totalorder %v127_v21, %v135_v23  ;;  %v327_v25 = vld [vmem:[%s299_s12 + $0x46] sm:$0xff]  ;;  %360 = vmatprep.mubr.msk.f32.mxu0 %vm56_vm0, %v323_v24  ;;  %v328_v28 = vld [vmem:[%s299_s12 + $0x4e] sm:$0xff] }
  0x34   : > { %vm372_vm6 = vmpackc.low %vm137_vm5, %vm136_vm4  ;;  %366 = vmatprep.mubr.msk.f32.mxu1 %vm56_vm0, %v327_v25  ;;  %v325_v29 = vld [vmem:[%s299_s12 + $0x26] sm:$0xff]  ;;  %v326_v31 = vld [vmem:[%s299_s12 + $0x2e] sm:$0xff]  ;;  %p431_p4 = por (%p30_p0), %p430_p3, %p429_p2 }
  0x35   : > { %373 = vmatprep.subr.msk.bf16.mxu0 %vm372_vm6, %v464_v26  ;;  %376 = vmatprep.subr.msk.bf16.mxu1 %vm372_vm6, %v464_v26  ;;  %v329_v30 = vld [vmem:[%s299_s12 + $0x66] sm:$0xff]  ;;  %v330_v32 = vld [vmem:[%s299_s12 + $0x6e] sm:$0xff] }
  0x36   : > { %375 = vmatpush3.bf16.msk.msra.mxu0 %vm372_vm6, %v464_v26  ;;  %377 = vmatpush3.bf16.msk.msra.mxu1 %vm372_vm6, %v464_v26  ;;  %p432_p5 = pnand (%p30_p0), %p431_p4, %p425_p1 }
  0x39   : > { %361 = vmatmul.mubr.msk.f32.vlgmr.msra.gmra.mrb[0].mxu0 %vm56_vm0, %v324_v27  ;;  %367 = vmatmul.mubr.msk.f32.vlgmr.msra.gmra.mrb[0].mxu1 %vm56_vm0, %v328_v28 }
  0x3a   : > { %363 = vmatprep.mubr.msk.f32.mxu0 %vm56_vm0, %v325_v29  ;;  %369 = vmatprep.mubr.msk.f32.mxu1 %vm56_vm0, %v329_v30 }
  0x3d   : > { %364 = vmatmul.mubr.msk.f32.gmra.mrb[2].mxu0 %vm56_vm0, %v326_v31  ;;  %370 = vmatmul.mubr.msk.f32.gmra.mrb[2].mxu1 %vm56_vm0, %v330_v32 }
 0x10c   : > { %v362_v33 = vpop.f32.mrb[0].mxu0  ;;  %v368_v34 = vpop.f32.mrb[0].mxu1  ;;  %32 = sbr.rel (!%p30_p0) target bundleno = 32 (0x20), region = 38 }
 0x10d   : > { %273 = vst.msk [vmem:[%s271_s13 + $0x8] sm:$0xff] %vm56_vm0, %v362_v33  ;;  %277 = vst.msk [vmem:[%s271_s13 + $0x28] sm:$0xff] %vm56_vm0, %v368_v34  ;;  %v232_v35 = vpop.f32.mrb[1].mxu0  ;;  %v252_v36 = vpop.f32.mrb[1].mxu1 }
 0x10e   : > { %272 = vst.msk [vmem:[%s271_s13] sm:$0xff] %vm56_vm0, %v232_v35  ;;  %276 = vst.msk [vmem:[%s271_s13 + $0x20] sm:$0xff] %vm56_vm0, %v252_v36 }
 0x110   : > { %v365_v37 = vpop.f32.mrb[2].mxu0  ;;  %v371_v38 = vpop.f32.mrb[2].mxu1 }
 0x111   : > { %275 = vst.msk [vmem:[%s271_s13 + $0x18] sm:$0xff] %vm56_vm0, %v365_v37  ;;  %279 = vst.msk [vmem:[%s271_s13 + $0x38] sm:$0xff] %vm56_vm0, %v371_v38  ;;  %v242_v39 = vpop.f32.mrb[3].mxu0  ;;  %v262_v40 = vpop.f32.mrb[3].mxu1 }
 0x112   : > { %274 = vst.msk [vmem:[%s271_s13 + $0x10] sm:$0xff] %vm56_vm0, %v242_v39  ;;  %278 = vst.msk [vmem:[%s271_s13 + $0x30] sm:$0xff] %vm56_vm0, %v262_v40 }
 0x113   :  { %435 = shalt.err (!%p432_p5)
}
 0x114   :  { %s436_s19 = scalar_lea.hbm %s590_s2, 2048 }
 0x115   :  { %p437_p6 = scmp.ne.s32.totalorder %s590_s2, %s436_s19  ;;  %p440_p7 = scmp.lt.u32.totalorder %s436_s19, %s590_s2 }
 0x117   :  { %p442_p8 = pnand %p440_p7, %p437_p6 }
 0x119   :  { %445 = shalt.err (!%p442_p8)
}
 0x11a   :  { %291 = dma.vmem_to_hbm [thread:$0]  %s286_s15, 2048, %s590_s2, [#allocation7], %s462_s28, %s462_s28, %s463_s29  }
 0x11b   :  { %454 = dma.done.wait [#allocation7], 2048  }
 0x11c   :  { %455 = vsyncadd [#allocation7], 4294965248 }
 0x11d   :  { %295 = vsyncpa [#allocation6], 1 }
 0x11e   :  { %296 = vsyncpa [#allocation7], 1 }

</bundles_post_ra>
